<compile_context>
chip_gen: v7x
topology: tpu7x:2x2x1
jax: 0.10.0
libtpu: 0.0.40
codegen_flags: <defaults>
</compile_context>

<pallas_src>
import jax
import jax.numpy as jnp
from jax.experimental import pallas as pl
from jax.experimental.pallas import tpu as pltpu

EPS = 1e-5  # PyTorch BatchNorm2d default


def cbn_kernel(x_ref, gamma_ref, beta_ref, out_ref):
    # x_ref:     (N, c_tile, HW) f32 — full (N, HW) reduction extent per tile
    # gamma_ref: (N, c_tile, 1)  f32 — per-sample, per-channel scale
    # beta_ref:  (N, c_tile, 1)  f32 — per-sample, per-channel shift
    x = x_ref[...]
    inv_n = 1.0 / float(x.shape[0] * x.shape[2])

    # Single sweep: sum and sum-of-squares (f32 accumulation), then the biased
    # variance E[x^2] - mean^2 used by training-mode BatchNorm2d.
    s1 = jnp.sum(x, axis=2, keepdims=True)        # lane reduce   (N, c, 1)
    s1 = jnp.sum(s1, axis=0, keepdims=True)       # batch reduce  (1, c, 1)
    s2 = jnp.sum(x * x, axis=2, keepdims=True)
    s2 = jnp.sum(s2, axis=0, keepdims=True)
    mean = s1 * inv_n                             # (1, c, 1)
    var = s2 * inv_n - mean * mean                # biased variance
    inv_std = jax.lax.rsqrt(var + EPS)            # (1, c, 1)

    # Fold BN + conditional affine: out = gamma*(x-mean)*inv_std + beta
    #                                   = x*scale + shift
    scale = gamma_ref[...] * inv_std              # (N, c, 1)
    shift = beta_ref[...] - scale * mean          # (N, c, 1)
    out_ref[...] = x * scale + shift              # one FMA per element, single
                                                  # lane-dense unmasked store


def _pick_c_tile(N, C, HW, bytes_per_elem, budget_bytes):
    """Largest channel tile whose double-buffered in+out blocks fit the budget.

    Returned tile divides C and is either C itself or a multiple of 8, so the
    (8,128) block-shape constraint on (c_tile, HW) is always satisfied.
    """
    per_channel = N * HW * bytes_per_elem
    # live VMEM per grid step ~ (x block + out block) * 2 double-buffers
    max_c = max(1, budget_bytes // (4 * per_channel))
    if C <= max_c:
        return C
    best = 0
    c = 8
    while c <= max_c:
        if C % c == 0:
            best = c
        c += 8
    if best:
        return best
    # TODO(synk): channel counts with no fitting multiple-of-8 divisor fall
    # back to whole-C blocks (may exceed VMEM for extreme shapes).
    return C


def conditional_batch_norm(x_nchw, y, embed_weight, nc):
    """x_nchw: (N, C, H, W) f32; y: (N,) int32; embed_weight: (n_classes, 2*nc)."""
    N, C, H, W = x_nchw.shape
    assert C == nc
    HW = H * W

    # Free, contiguous reshape — no transposes, HW becomes the lane dimension.
    x3 = x_nchw.reshape(N, C, HW).astype(jnp.float32)

    # Embedding lookup (gather) + chunk, kept NCHW-aligned: (N, C, 1).
    out_y = jnp.take(embed_weight, y, axis=0)                  # (N, 2*nc)
    gamma = out_y[:, :nc].astype(jnp.float32)[:, :, None]      # (N, C, 1)
    beta = out_y[:, nc:].astype(jnp.float32)[:, :, None]       # (N, C, 1)

    bytes_per_elem = jnp.dtype(jnp.float32).itemsize
    # Working-set target: conservative enough for v7x's 64 MiB physical VMEM
    # while still giving multi-MiB, pipeline-friendly blocks on v5e/v6e.
    vmem_budget = 32 * 1024 * 1024
    c_tile = _pick_c_tile(N, C, HW, bytes_per_elem, vmem_budget)
    num_tiles = C // c_tile

    block_bytes = N * c_tile * HW * bytes_per_elem
    # in + out, double-buffered, plus gamma/beta + slack; keep below v7x limits.
    vmem_limit = int(min(48 * 1024 * 1024,
                         max(16 * 1024 * 1024, 4 * block_bytes + (1 << 20))))

    out3 = pl.pallas_call(
        cbn_kernel,
        out_shape=jax.ShapeDtypeStruct((N, C, HW), jnp.float32),
        grid=(num_tiles,),
        in_specs=[
            pl.BlockSpec((N, c_tile, HW), lambda i: (0, i, 0)),
            pl.BlockSpec((N, c_tile, 1), lambda i: (0, i, 0)),
            pl.BlockSpec((N, c_tile, 1), lambda i: (0, i, 0)),
        ],
        out_specs=pl.BlockSpec((N, c_tile, HW), lambda i: (0, i, 0)),
        compiler_params=pltpu.CompilerParams(
            dimension_semantics=("parallel",),   # channel tiles are independent
            vmem_limit_bytes=vmem_limit,
        ),
    )(x3, gamma, beta)

    # Free reshape back to NCHW (layout never changed).
    return out3.reshape(N, C, H, W)


def reference(x_nchw, y, embed_weight, nc):
    mean = jnp.mean(x_nchw, axis=(0, 2, 3), keepdims=True)
    var = jnp.mean((x_nchw - mean) ** 2, axis=(0, 2, 3), keepdims=True)
    xhat = (x_nchw - mean) / jnp.sqrt(var + EPS)
    out_y = jnp.take(embed_weight, y, axis=0)
    gamma = out_y[:, :nc].reshape(-1, nc, 1, 1)
    beta = out_y[:, nc:].reshape(-1, nc, 1, 1)
    return gamma * xhat + beta


if __name__ == "__main__":
    n_classes = 10
    nc = 4
    N, H, W = 2, 16, 16

    key = jax.random.PRNGKey(0)
    k_x, k_y, k_w = jax.random.split(key, 3)

    # Inputs
    x = jax.random.normal(k_x, (N, nc, H, W), dtype=jnp.float32)
    y = jax.random.randint(k_y, (N,), 0, n_classes, dtype=jnp.int32)

    # Deterministic parameter init mirroring the module's __init__:
    #   embed.weight[:, :nc] ~ N(0, 0.02), embed.weight[:, nc:] = 0
    gamma_part = 0.02 * jax.random.normal(k_w, (n_classes, nc), dtype=jnp.float32)
    beta_part = jnp.zeros((n_classes, nc), dtype=jnp.float32)
    embed_weight = jnp.concatenate([gamma_part, beta_part], axis=1)  # (n_classes, 2*nc)

    out = conditional_batch_norm(x, y, embed_weight, nc)
    jax.block_until_ready(out)

    ref = reference(x, y, embed_weight, nc)
    assert out.shape == (N, nc, H, W)
    assert jnp.allclose(out, ref, atol=1e-5, rtol=1e-5)

    print("KERNEL_OK")
</pallas_src>

<mosaic_0001>
module attributes {stable_mosaic.version = 11 : i64} {
  func.func @cbn_kernel(%arg0: i32, %arg1: memref<2x4x256xf32, #tpu.memory_space<vmem>>, %arg2: memref<2x4x1xf32, #tpu.memory_space<vmem>>, %arg3: memref<2x4x1xf32, #tpu.memory_space<vmem>>, %arg4: memref<2x4x256xf32, #tpu.memory_space<vmem>>) attributes {dimension_semantics = [#tpu.dimension_semantics<parallel>], iteration_bounds = array<i64: 1>, scalar_prefetch = 0 : i64, scratch_operands = 0 : i64, tpu.core_type = #tpu.core_type<tc>, window_params = [{transform_indices = @transform_0, window_bounds = array<i64: 2, 4, 256>}, {transform_indices = @transform_1, window_bounds = array<i64: 2, 4, 1>}, {transform_indices = @transform_2, window_bounds = array<i64: 2, 4, 1>}, {transform_indices = @transform_3, window_bounds = array<i64: 2, 4, 256>}]} {
    %c0 = arith.constant 0 : index
    %c0_0 = arith.constant 0 : index
    %c0_1 = arith.constant 0 : index
    %0 = vector.load %arg1[%c0, %c0_0, %c0_1] : memref<2x4x256xf32, #tpu.memory_space<vmem>>, vector<2x4x256xf32>
    %cst = arith.constant dense<0.000000e+00> : vector<2x4xf32>
    %1 = vector.multi_reduction <add>, %0, %cst [2] : vector<2x4x256xf32> to vector<2x4xf32>
    %2 = vector.shape_cast %1 : vector<2x4xf32> to vector<2x4x1xf32>
    %cst_2 = arith.constant dense<0.000000e+00> : vector<4x1xf32>
    %3 = vector.multi_reduction <add>, %2, %cst_2 [0] : vector<2x4x1xf32> to vector<4x1xf32>
    %4 = vector.shape_cast %3 : vector<4x1xf32> to vector<1x4x1xf32>
    %5 = arith.mulf %0, %0 : vector<2x4x256xf32>
    %cst_3 = arith.constant dense<0.000000e+00> : vector<2x4xf32>
    %6 = vector.multi_reduction <add>, %5, %cst_3 [2] : vector<2x4x256xf32> to vector<2x4xf32>
    %7 = vector.shape_cast %6 : vector<2x4xf32> to vector<2x4x1xf32>
    %cst_4 = arith.constant dense<0.000000e+00> : vector<4x1xf32>
    %8 = vector.multi_reduction <add>, %7, %cst_4 [0] : vector<2x4x1xf32> to vector<4x1xf32>
    %9 = vector.shape_cast %8 : vector<4x1xf32> to vector<1x4x1xf32>
    %cst_5 = arith.constant 0.001953125 : f32
    %10 = vector.broadcast %cst_5 : f32 to vector<1x4x1xf32>
    %11 = arith.mulf %4, %10 : vector<1x4x1xf32>
    %cst_6 = arith.constant 0.001953125 : f32
    %12 = vector.broadcast %cst_6 : f32 to vector<1x4x1xf32>
    %13 = arith.mulf %9, %12 : vector<1x4x1xf32>
    %14 = arith.mulf %11, %11 : vector<1x4x1xf32>
    %15 = arith.subf %13, %14 : vector<1x4x1xf32>
    %cst_7 = arith.constant 9.99999974E-6 : f32
    %16 = vector.broadcast %cst_7 : f32 to vector<1x4x1xf32>
    %17 = arith.addf %15, %16 : vector<1x4x1xf32>
    %18 = math.rsqrt %17 : vector<1x4x1xf32>
    %c0_8 = arith.constant 0 : index
    %c0_9 = arith.constant 0 : index
    %c0_10 = arith.constant 0 : index
    %19 = vector.load %arg2[%c0_8, %c0_9, %c0_10] : memref<2x4x1xf32, #tpu.memory_space<vmem>>, vector<2x4x1xf32>
    %20 = vector.broadcast %18 : vector<1x4x1xf32> to vector<2x4x1xf32>
    %21 = arith.mulf %19, %20 : vector<2x4x1xf32>
    %c0_11 = arith.constant 0 : index
    %c0_12 = arith.constant 0 : index
    %c0_13 = arith.constant 0 : index
    %22 = vector.load %arg3[%c0_11, %c0_12, %c0_13] : memref<2x4x1xf32, #tpu.memory_space<vmem>>, vector<2x4x1xf32>
    %23 = vector.broadcast %11 : vector<1x4x1xf32> to vector<2x4x1xf32>
    %24 = arith.mulf %21, %23 : vector<2x4x1xf32>
    %25 = arith.subf %22, %24 : vector<2x4x1xf32>
    %26 = vector.broadcast %21 : vector<2x4x1xf32> to vector<2x4x256xf32>
    %27 = arith.mulf %0, %26 : vector<2x4x256xf32>
    %28 = vector.broadcast %25 : vector<2x4x1xf32> to vector<2x4x256xf32>
    %29 = arith.addf %27, %28 : vector<2x4x256xf32>
    %c0_14 = arith.constant 0 : index
    %c0_15 = arith.constant 0 : index
    %c0_16 = arith.constant 0 : index
    %30 = vector.load %arg4[%c0_14, %c0_15, %c0_16] : memref<2x4x256xf32, #tpu.memory_space<vmem>>, vector<2x4x256xf32>
    tpu.vector_store %arg4[%c0_14, %c0_15, %c0_16], %29 {strides = array<i32>} : memref<2x4x256xf32, #tpu.memory_space<vmem>>, vector<2x4x256xf32>,
    return
  }
  func.func @transform_0(%arg0: i32) -> (i32, i32, i32) {
    %c0_i32 = arith.constant 0 : i32
    %c0_i32_0 = arith.constant 0 : i32
    %c0_i32_1 = arith.constant 0 : i32
    return %c0_i32, %arg0, %c0_i32_0 : i32, i32, i32
  }
  func.func @transform_1(%arg0: i32) -> (i32, i32, i32) {
    %c0_i32 = arith.constant 0 : i32
    %c0_i32_0 = arith.constant 0 : i32
    %c0_i32_1 = arith.constant 0 : i32
    return %c0_i32, %arg0, %c0_i32_0 : i32, i32, i32
  }
  func.func @transform_2(%arg0: i32) -> (i32, i32, i32) {
    %c0_i32 = arith.constant 0 : i32
    %c0_i32_0 = arith.constant 0 : i32
    %c0_i32_1 = arith.constant 0 : i32
    return %c0_i32, %arg0, %c0_i32_0 : i32, i32, i32
  }
  func.func @transform_3(%arg0: i32) -> (i32, i32, i32) {
    %c0_i32 = arith.constant 0 : i32
    %c0_i32_0 = arith.constant 0 : i32
    %c0_i32_1 = arith.constant 0 : i32
    return %c0_i32, %arg0, %c0_i32_0 : i32, i32, i32
  }
}

</mosaic_0001>

<bundles_post_ra>
// kernel: tpu_custom_call.1
= control target key start
LH: loop header
LB: loop body
LE: loop exit
PB: predicated region body
PF: predicated region fallthrough
CT: control target
= control target key end

     0   :  { %vm23_vm0 = vcmask 1043456   ;;  %s262_s0 = inlined_call_operand.vmem [shape: f32[2,4,256], index: 0, kind: input, shape index: {}]   ;;  %s263_s1 = inlined_call_operand.vmem [shape: f32[2,4,1], index: 1, kind: input, shape index: {}]   ;;  %s264_s2 = inlined_call_operand.vmem [shape: f32[2,4,1], index: 2, kind: input, shape index: {}]   ;;  %s265_s3 = inlined_call_operand.hbm [shape: f32[2,4,256], index: 3, kind: output, shape index: {}]  }
   0x1   :  { %v207_v0 = vld [vmem:[%s262_s0] sm:$0xff]  ;;  %v212_v1 = vld [vmem:[%s262_s0 + $0x8] sm:$0xff] }
   0x2   :  { %8 = vsyncpa [#allocation3], 0  ;;  %v19_v2 = vcombine.high %v207_v0, %v207_v0  ;;  %v24_v3 = vsel %vm23_vm0, %v207_v0, 0.0  ;;  %v37_v4 = vmul.f32 %v207_v0, %v207_v0  ;;  %v20_v5 = vcombine.high %v212_v1, %v212_v1  ;;  %v65_v36 = vld [vmem:[%s263_s1 + $0x4] sm:$0xf] }
   0x3   :  { %v29_v6 = vsel %vm23_vm0, %v212_v1, 0.0  ;;  %v38_v7 = vmul.f32 %v212_v1, %v212_v1  ;;  %v179_v20 = vmov 0   ;;  %v64_v37 = vld [vmem:[%s263_s1] sm:$0xf]  ;;  %v69_v45 = vld [vmem:[%s264_s2 + $0x4] sm:$0xf]  ;;  %v85_v49 = vlaneseq }
   0x4   :  { %v25_v8 = vsel %vm23_vm0, %v19_v2, 0.0  ;;  %v41_v9 = vcombine.high %v37_v4, %v37_v4  ;;  %v45_v10 = vsel %vm23_vm0, %v37_v4, 0.0  ;;  %v30_v11 = vsel %vm23_vm0, %v20_v5, 0.0  ;;  %150 = vset.pattern.permute.xlu1 %v179_v20  ;;  %149 = vset.pattern.permute.xlu0 %v179_v20  ;;  %v68_v41 = vld [vmem:[%s264_s2] sm:$0xf]  ;;  %s181_s1 = smov [#allocation2]  }
   0x5   :  { %v26_v12 = vadd.f32 %v25_v8, %v24_v3  ;;  %v42_v13 = vcombine.high %v38_v7, %v38_v7  ;;  %v50_v15 = vsel %vm23_vm0, %v38_v7, 0.0  ;;  %v31_v17 = vadd.f32 %v30_v11, %v29_v6  ;;  %s133_s2 = sshll.u32 %s181_s1, 4  ;;  %s134_s2 = int_to_ptr.vmem [resolvable:$true] %s133_s2 }
   0x6   :  { %v46_v14 = vsel %vm23_vm0, %v41_v9, 0.0  ;;  %v180_v47 = vmov 839922192   ;;  %v86_v51 = vshrl.u32 %v85_v49, 7  ;;  %s155_s23 = scalar_lea.vmem %s134_s2, 256  ;;  %p160_p1 = scmp.lt.s32.totalorder %s134_s2, %s134_s2 }
   0x7   :  { %27 = vadd.xlane.f32.xlu0 %v26_v12  ;;  %v47_v16 = vadd.f32 %v46_v14, %v45_v10  ;;  %v51_v18 = vsel %vm23_vm0, %v42_v13, 0.0  ;;  %v83_v48 = vunpack.c.l.s4 %v180_v47  ;;  %p156_p0 = scmp.ne.s32.totalorder %s134_s2, %s155_s23  ;;  %p161_p2 = scmp.lt.s32.totalorder %s155_s23, %s155_s23 }
   0x8   :  { %v52_v19 = vadd.f32 %v51_v18, %v50_v15 }
   0x9   :  { %48 = vadd.xlane.f32.xlu1 %v47_v16  ;;  %v84_v50 = vunpack.c.0.s8 %v83_v48  ;;  %p162_p3 = por %p161_p2, %p160_p1 }
   0xb   :  { %32 = vadd.xlane.f32.xlu0 %v31_v17  ;;  %v87_v52 = vsub.s32 %v84_v50, %v86_v51  ;;  %p163_p4 = pnand %p162_p3, %p156_p0 }
   0xd   :  { %53 = vadd.xlane.f32.xlu1 %v52_v19 }
  0x94   :  { %v28_v21 = vpop.xlane.xlu0 %27 }
  0x95   :  { %v34_v24 = vsel %vm23_vm0, %v28_v21, 0.0 }
  0x96   :  { %v49_v22 = vpop.xlane.xlu1 %48 }
  0x97   :  { %v55_v28 = vsel %vm23_vm0, %v49_v22, 0.0 }
  0x98   :  { %v33_v23 = vpop.xlane.xlu0 %32 }
  0x99   :  { %v35_v25 = vsel %vm23_vm0, %v33_v23, 0.0 }
  0x9a   :  { %v36_v26 = vadd.f32 %v35_v25, %v34_v24  ;;  %v54_v27 = vpop.xlane.xlu1 %53 }
  0x9b   :  { %v56_v29 = vsel %vm23_vm0, %v54_v27, 0.0 }
  0x9c   :  { %v58_v30 = vmul.f32 0.001953125, %v36_v26  ;;  %v57_v31 = vadd.f32 %v56_v29, %v55_v28 }
  0x9e   :  { %v59_v32 = vmul.f32 0.001953125, %v57_v31  ;;  %v60_v33 = vmul.f32 %v58_v30, %v58_v30 }
  0xa0   :  { %v61_v34 = vsub.f32 %v59_v32, %v60_v33 }
  0xa2   :  { %v62_v35 = vadd.f32 1e-05, %v61_v34 }
  0xa4   :  { %153 = vrsqrt.f32 %v62_v35 }
  0xae   :  { %v154_v38 = vpop.eup %153 }
  0xaf   :  { %v67_v39 = vmul.f32 %v154_v38, %v65_v36  ;;  %v66_v40 = vmul.f32 %v154_v38, %v64_v37 }
  0xb1   :  { %80 = vperm.xlu1 %150, %v67_v39   ;;  %76 = vperm.xlu0 %149, %v66_v40   ;;  %v70_v42 = vmul.f32 %v66_v40, %v58_v30  ;;  %v71_v44 = vmul.f32 %v67_v39, %v58_v30 }
  0xb3   :  { %v72_v43 = vsub.f32 %v68_v41, %v70_v42  ;;  %v73_v46 = vsub.f32 %v69_v45, %v71_v44 }
  0xb5   :  { %102 = vperm.xlu1 %150, %v72_v43  }
  0xb9   :  { %106 = vperm.xlu1 %150, %v73_v46  }
 0x130   :  { %v81_v53 = vpop.permute.xlu1 %80  ;;  %v77_v54 = vpop.permute.xlu0 %76 }
 0x131   :  { %v88_v55 = vrot.slane %v77_v54, %v87_v52  ;;  %v95_v57 = vrot.slane %v81_v53, %v87_v52 }
 0x133   :  { %v98_v58 = vmul.f32 %v88_v55, %v207_v0  ;;  %v99_v62 = vmul.f32 %v95_v57, %v212_v1 }
 0x134   :  { %v103_v56 = vpop.permute.xlu1 %102 }
 0x135   :  { %v114_v59 = vrot.slane %v103_v56, %v87_v52 }
 0x137   :  { %v124_v60 = vadd.f32 %v114_v59, %v98_v58 }
 0x138   :  { %v107_v61 = vpop.permute.xlu1 %106 }
 0x139   :  { %126 = vst [vmem:[#allocation2] sm:$0xff] %v124_v60  ;;  %v121_v63 = vrot.slane %v107_v61, %v87_v52 }
 0x13b   :  { %v125_v2 = vadd.f32 %v121_v63, %v99_v62 }
 0x13d   :  { %127 = vst [vmem:[#allocation2 + $0x8] sm:$0xff] %v125_v2 }
 0x13e   :  { %166 = shalt.err (!%p163_p4)
}
 0x13f   :  { %s167_s26 = scalar_lea.hbm %s265_s3, 256 }
 0x140   :  { %p168_p5 = scmp.ne.s32.totalorder %s265_s3, %s167_s26  ;;  %p171_p6 = scmp.lt.u32.totalorder %s167_s26, %s265_s3 }
 0x142   :  { %p173_p7 = pnand %p171_p6, %p168_p5 }
 0x144   :  { %176 = shalt.err (!%p173_p7)
}
 0x145   :  { %s182_s4 = smov 128   ;;  %s183_s5 = smov 8  }
 0x146   :  { %139 = dma.vmem_to_hbm [thread:$0]  %s134_s2, 256, %s265_s3, [#allocation3], %s182_s4, %s182_s4, %s183_s5  }
 0x147   :  { %177 = dma.done.wait [#allocation3], 256  }
 0x148   :  { %178 = vsyncadd [#allocation3], 4294967040 }
 0x149   :  { %143 = vsyncpa [#allocation3], 1 }

</bundles_post_ra>
